<compile_context>
chip_gen: v7x
topology: tpu7x:2x2x1
jax: 0.10.0
libtpu: 0.0.40
codegen_flags: <defaults>
</compile_context>

<pallas_src>
import functools

import jax
import jax.numpy as jnp
from jax.experimental import pallas as pl
from jax.experimental.pallas import tpu as pltpu


def mlp_kernel(x_ref, w1_ref, b1_ref, w2_ref, b2_ref, w3_ref, b3_ref, o_ref,
               *, act_dtype):
    # Linear(nz,128) -> Tanh -> Linear(128,128) -> Tanh -> Linear(128,2)
    # bf16 matmul operands with f32 MXU accumulation; bias-add + tanh in
    # act_dtype (bf16 on v6e/v7x, f32 on v5e where there is no bf16 VPU/EUP).
    x = x_ref[...].astype(jnp.bfloat16)                                # (TB, nz)
    a1 = jnp.dot(x, w1_ref[...], preferred_element_type=jnp.float32)  # (TB, H)
    h1 = jnp.tanh(a1.astype(act_dtype) + b1_ref[...])
    a2 = jnp.dot(h1.astype(jnp.bfloat16), w2_ref[...],
                 preferred_element_type=jnp.float32)                  # (TB, H)
    h2 = jnp.tanh(a2.astype(act_dtype) + b2_ref[...])
    a3 = jnp.dot(h2.astype(jnp.bfloat16), w3_ref[...],
                 preferred_element_type=jnp.float32)                  # (TB, 2)
    o_ref[...] = (a3 + b3_ref[...]).astype(o_ref.dtype)


def _bf16_activations_ok():
    # bf16 VPU/EUP exists on v6e (Trillium) and newer; keep f32 tanh on <= v5.
    try:
        kind = jax.devices()[0].device_kind.lower()
    except Exception:
        return False
    return not any(tag in kind for tag in ("v2", "v3", "v4", "v5"))


def _pick_tile(B, tb_max):
    # >= 2 roughly equal grid steps so both v7x TensorCores get work; multiple
    # of 16 rows (bf16 packs 2 rows/sublane); capped so per-step VMEM is small.
    TB = min(tb_max, max(16, pl.cdiv(B, 2)))
    return pl.cdiv(TB, 16) * 16


def mog_netG_sohil_forward(x, params, tb_max=2048):
    """x: (B, nz) f32. params: (w1,b1,w2,b2,w3,b3) with w_i as (in,out) f32."""
    w1, b1, w2, b2, w3, b3 = params
    B, nz = x.shape
    H = w1.shape[1]      # 128
    OUT = w3.shape[1]    # 2

    TB = _pick_tile(B, tb_max)
    grid = (pl.cdiv(B, TB),)   # partial last block handled by Pallas (masked store)

    act_dtype = jnp.bfloat16 if _bf16_activations_ok() else jnp.float32

    # Weights are tiny: cast once, kept VMEM-resident via constant index_maps.
    w1_b = w1.astype(jnp.bfloat16)
    w2_b = w2.astype(jnp.bfloat16)
    w3_b = w3.astype(jnp.bfloat16)
    b1_a = b1.astype(act_dtype)
    b2_a = b2.astype(act_dtype)
    b3_f = b3.astype(jnp.float32)

    const = lambda i: (0, 0)   # same block every grid step -> stays resident

    kernel = functools.partial(mlp_kernel, act_dtype=act_dtype)

    return pl.pallas_call(
        kernel,
        out_shape=jax.ShapeDtypeStruct((B, OUT), jnp.float32),
        grid=grid,
        in_specs=[
            pl.BlockSpec((TB, nz), lambda i: (i, 0)),   # x tile: f32, unpadded
            pl.BlockSpec((nz, H), const),               # w1 (resident)
            pl.BlockSpec((1, H), const),                # b1
            pl.BlockSpec((H, H), const),                # w2
            pl.BlockSpec((1, H), const),                # b2
            pl.BlockSpec((H, OUT), const),              # w3 (unpadded, 2 cols)
            pl.BlockSpec((1, OUT), const),              # b3
        ],
        out_specs=pl.BlockSpec((TB, OUT), lambda i: (i, 0)),  # narrow contiguous out
        compiler_params=pltpu.CompilerParams(
            dimension_semantics=("parallel",)),         # megacore on v7x
    )(x, w1_b, b1_a, w2_b, b2_a, w3_b, b3_f)


def init_params(key, nz, hidden=128, out=2):
    # Deterministic synthetic init (uniform like PyTorch's default Linear init scale).
    ks = jax.random.split(key, 6)

    def lin(kw, kb, fan_in, fan_out):
        bound = 1.0 / jnp.sqrt(fan_in)
        w = jax.random.uniform(kw, (fan_in, fan_out), jnp.float32, -bound, bound)
        b = jax.random.uniform(kb, (1, fan_out), jnp.float32, -bound, bound)
        return w, b

    w1, b1 = lin(ks[0], ks[1], nz, hidden)
    w2, b2 = lin(ks[2], ks[3], hidden, hidden)
    w3, b3 = lin(ks[4], ks[5], hidden, out)
    return (w1, b1, w2, b2, w3, b3)


def _reference(x, params):
    w1, b1, w2, b2, w3, b3 = params
    h = jnp.tanh(x @ w1 + b1)
    h = jnp.tanh(h @ w2 + b2)
    return h @ w3 + b3


if __name__ == "__main__":
    key = jax.random.PRNGKey(0)
    k_in1, k_in2, k_par = jax.random.split(key, 3)

    nz = 32
    params = init_params(k_par, nz)

    # Case 1: tiny batch -> single (partial) grid step, masked tail store.
    B1 = 8
    x1 = jax.random.normal(k_in1, (B1, nz), jnp.float32)
    out1 = jax.block_until_ready(mog_netG_sohil_forward(x1, params))
    ref1 = _reference(x1, params)
    assert out1.shape == (B1, 2)
    # bf16 matmul operands (and bf16 tanh on v6e+) -> loosened tolerance.
    assert jnp.allclose(out1, ref1, atol=3e-2, rtol=3e-2)

    # Case 2: batch not divisible by the tile -> 2 grid steps + partial last block.
    B2 = 50
    x2 = jax.random.normal(k_in2, (B2, nz), jnp.float32)
    out2 = jax.block_until_ready(mog_netG_sohil_forward(x2, params))
    ref2 = _reference(x2, params)
    assert out2.shape == (B2, 2)
    assert jnp.allclose(out2, ref2, atol=3e-2, rtol=3e-2)

    print("KERNEL_OK")
</pallas_src>

<mosaic_0001>
module attributes {stable_mosaic.version = 11 : i64} {
  func.func @mlp_kernel(%arg0: i32, %arg1: memref<16x32xf32, #tpu.memory_space<vmem>>, %arg2: memref<32x128xbf16, #tpu.memory_space<vmem>>, %arg3: memref<1x128xbf16, #tpu.memory_space<vmem>>, %arg4: memref<128x128xbf16, #tpu.memory_space<vmem>>, %arg5: memref<1x128xbf16, #tpu.memory_space<vmem>>, %arg6: memref<128x2xbf16, #tpu.memory_space<vmem>>, %arg7: memref<1x2xf32, #tpu.memory_space<vmem>>, %arg8: memref<16x2xf32, #tpu.memory_space<vmem>>) attributes {dimension_semantics = [#tpu.dimension_semantics<parallel>], iteration_bounds = array<i64: 1>, scalar_prefetch = 0 : i64, scratch_operands = 0 : i64, tpu.core_type = #tpu.core_type<tc>, window_params = [{transform_indices = @transform_0, window_bounds = array<i64: 16, 32>}, {pipeline_mode = #tpu.pipeline_mode<synchronous>, transform_indices = @transform_1, window_bounds = array<i64: 32, 128>}, {pipeline_mode = #tpu.pipeline_mode<synchronous>, transform_indices = @transform_2, window_bounds = array<i64: 1, 128>}, {pipeline_mode = #tpu.pipeline_mode<synchronous>, transform_indices = @transform_3, window_bounds = array<i64: 128, 128>}, {pipeline_mode = #tpu.pipeline_mode<synchronous>, transform_indices = @transform_4, window_bounds = array<i64: 1, 128>}, {pipeline_mode = #tpu.pipeline_mode<synchronous>, transform_indices = @transform_5, window_bounds = array<i64: 128, 2>}, {pipeline_mode = #tpu.pipeline_mode<synchronous>, transform_indices = @transform_6, window_bounds = array<i64: 1, 2>}, {transform_indices = @transform_7, window_bounds = array<i64: 16, 2>}]} {
    %c0 = arith.constant 0 : index
    %c0_0 = arith.constant 0 : index
    %0 = vector.load %arg1[%c0, %c0_0] : memref<16x32xf32, #tpu.memory_space<vmem>>, vector<16x32xf32>
    %1 = arith.truncf %0 : vector<16x32xf32> to vector<16x32xbf16>
    %c0_1 = arith.constant 0 : index
    %c0_2 = arith.constant 0 : index
    %2 = vector.load %arg2[%c0_1, %c0_2] : memref<32x128xbf16, #tpu.memory_space<vmem>>, vector<32x128xbf16>
    %cst = arith.constant dense<0.000000e+00> : vector<16x128xf32>
    %3 = tpu.matmul %1, %2, %cst {dimension_numbers = #tpu.dot_dimension_numbers<[1], [0], [0], [1], [0, 0, 1, 1], [], []>} : vector<16x32xbf16>, vector<32x128xbf16>, vector<16x128xf32> -> vector<16x128xf32>
    %4 = arith.truncf %3 : vector<16x128xf32> to vector<16x128xbf16>
    %c0_3 = arith.constant 0 : index
    %c0_4 = arith.constant 0 : index
    %5 = vector.load %arg3[%c0_3, %c0_4] : memref<1x128xbf16, #tpu.memory_space<vmem>>, vector<1x128xbf16>
    %6 = vector.broadcast %5 : vector<1x128xbf16> to vector<16x128xbf16>
    %7 = arith.addf %4, %6 : vector<16x128xbf16>
    %8 = math.tanh %7 : vector<16x128xbf16>
    %c0_5 = arith.constant 0 : index
    %c0_6 = arith.constant 0 : index
    %9 = vector.load %arg4[%c0_5, %c0_6] : memref<128x128xbf16, #tpu.memory_space<vmem>>, vector<128x128xbf16>
    %cst_7 = arith.constant dense<0.000000e+00> : vector<16x128xf32>
    %10 = tpu.matmul %8, %9, %cst_7 {dimension_numbers = #tpu.dot_dimension_numbers<[1], [0], [0], [1], [0, 0, 1, 1], [], []>} : vector<16x128xbf16>, vector<128x128xbf16>, vector<16x128xf32> -> vector<16x128xf32>
    %11 = arith.truncf %10 : vector<16x128xf32> to vector<16x128xbf16>
    %c0_8 = arith.constant 0 : index
    %c0_9 = arith.constant 0 : index
    %12 = vector.load %arg5[%c0_8, %c0_9] : memref<1x128xbf16, #tpu.memory_space<vmem>>, vector<1x128xbf16>
    %13 = vector.broadcast %12 : vector<1x128xbf16> to vector<16x128xbf16>
    %14 = arith.addf %11, %13 : vector<16x128xbf16>
    %15 = math.tanh %14 : vector<16x128xbf16>
    %c0_10 = arith.constant 0 : index
    %c0_11 = arith.constant 0 : index
    %16 = vector.load %arg6[%c0_10, %c0_11] : memref<128x2xbf16, #tpu.memory_space<vmem>>, vector<128x2xbf16>
    %cst_12 = arith.constant dense<0.000000e+00> : vector<16x2xf32>
    %17 = tpu.matmul %15, %16, %cst_12 {dimension_numbers = #tpu.dot_dimension_numbers<[1], [0], [0], [1], [0, 0, 1, 1], [], []>} : vector<16x128xbf16>, vector<128x2xbf16>, vector<16x2xf32> -> vector<16x2xf32>
    %c0_13 = arith.constant 0 : index
    %c0_14 = arith.constant 0 : index
    %18 = vector.load %arg7[%c0_13, %c0_14] : memref<1x2xf32, #tpu.memory_space<vmem>>, vector<1x2xf32>
    %19 = vector.broadcast %18 : vector<1x2xf32> to vector<16x2xf32>
    %20 = arith.addf %17, %19 : vector<16x2xf32>
    %c0_15 = arith.constant 0 : index
    %c0_16 = arith.constant 0 : index
    %21 = vector.load %arg8[%c0_15, %c0_16] : memref<16x2xf32, #tpu.memory_space<vmem>>, vector<16x2xf32>
    tpu.vector_store %arg8[%c0_15, %c0_16], %20 {strides = array<i32>} : memref<16x2xf32, #tpu.memory_space<vmem>>, vector<16x2xf32>,
    return
  }
  func.func @transform_0(%arg0: i32) -> (i32, i32) {
    %c0_i32 = arith.constant 0 : i32
    %c0_i32_0 = arith.constant 0 : i32
    return %arg0, %c0_i32 : i32, i32
  }
  func.func @transform_1(%arg0: i32) -> (i32, i32) {
    %c0_i32 = arith.constant 0 : i32
    %c0_i32_0 = arith.constant 0 : i32
    %c0_i32_1 = arith.constant 0 : i32
    return %c0_i32, %c0_i32_0 : i32, i32
  }
  func.func @transform_2(%arg0: i32) -> (i32, i32) {
    %c0_i32 = arith.constant 0 : i32
    %c0_i32_0 = arith.constant 0 : i32
    %c0_i32_1 = arith.constant 0 : i32
    return %c0_i32, %c0_i32_0 : i32, i32
  }
  func.func @transform_3(%arg0: i32) -> (i32, i32) {
    %c0_i32 = arith.constant 0 : i32
    %c0_i32_0 = arith.constant 0 : i32
    %c0_i32_1 = arith.constant 0 : i32
    return %c0_i32, %c0_i32_0 : i32, i32
  }
  func.func @transform_4(%arg0: i32) -> (i32, i32) {
    %c0_i32 = arith.constant 0 : i32
    %c0_i32_0 = arith.constant 0 : i32
    %c0_i32_1 = arith.constant 0 : i32
    return %c0_i32, %c0_i32_0 : i32, i32
  }
  func.func @transform_5(%arg0: i32) -> (i32, i32) {
    %c0_i32 = arith.constant 0 : i32
    %c0_i32_0 = arith.constant 0 : i32
    %c0_i32_1 = arith.constant 0 : i32
    return %c0_i32, %c0_i32_0 : i32, i32
  }
  func.func @transform_6(%arg0: i32) -> (i32, i32) {
    %c0_i32 = arith.constant 0 : i32
    %c0_i32_0 = arith.constant 0 : i32
    %c0_i32_1 = arith.constant 0 : i32
    return %c0_i32, %c0_i32_0 : i32, i32
  }
  func.func @transform_7(%arg0: i32) -> (i32, i32) {
    %c0_i32 = arith.constant 0 : i32
    %c0_i32_0 = arith.constant 0 : i32
    return %arg0, %c0_i32 : i32, i32
  }
}

</mosaic_0001>

<bundles_post_ra>
// kernel: tpu_custom_call.1
= control target key start
LH: loop header
LB: loop body
LE: loop exit
PB: predicated region body
PF: predicated region fallthrough
CT: control target
= control target key end

     0   :  { %12 = vsyncpa [#allocation3], 0  ;;  %s528_s24 = smov [#allocation2]   ;;  %s675_s0 = inlined_call_operand.vmem [shape: f32[8,32], index: 0, kind: input, shape index: {}]   ;;  %s676_s1 = inlined_call_operand.hbm [shape: bf16[32,128], index: 1, kind: input, shape index: {}]   ;;  %s677_s2 = inlined_call_operand.vmem [shape: bf16[1,128], index: 2, kind: input, shape index: {}]   ;;  %s678_s3 = inlined_call_operand.vmem [shape: bf16[128,128], index: 3, kind: input, shape index: {}]   ;;  %s679_s4 = inlined_call_operand.vmem [shape: bf16[1,128], index: 4, kind: input, shape index: {}]   ;;  %s680_s5 = inlined_call_operand.vmem [shape: bf16[128,2], index: 5, kind: input, shape index: {}]   ;;  %s681_s6 = inlined_call_operand.vmem [shape: f32[1,2], index: 6, kind: input, shape index: {}]   ;;  %s682_s7 = inlined_call_operand.vmem [shape: f32[8,2], index: 7, kind: output, shape index: {}]  }
   0x1   :  { %s20_s25 = sshll.u32 %s528_s24, 4  ;;  %s504_s28 = scalar_lea.hbm %s676_s1, 256  ;;  %s21_s25 = int_to_ptr.vmem [resolvable:$true] %s20_s25 }
   0x2   :  { %p505_p0 = scmp.ne.s32.totalorder %s676_s1, %s504_s28  ;;  %p508_p1 = scmp.lt.u32.totalorder %s504_s28, %s676_s1 }
   0x4   :  { %p510_p2 = pnand %p508_p1, %p505_p0 }
   0x6   :  { %513 = shalt.err (!%p510_p2)
}
   0x7   :  { %s514_s10 = scalar_lea.vmem %s21_s25, 256  ;;  %p519_p4 = scmp.lt.s32.totalorder %s21_s25, %s21_s25 }
   0x8   :  { %p515_p3 = scmp.ne.s32.totalorder %s21_s25, %s514_s10  ;;  %p520_p5 = scmp.lt.s32.totalorder %s514_s10, %s514_s10 }
   0xa   :  { %p521_p6 = por %p520_p5, %p519_p4 }
   0xc   :  { %p522_p7 = pnand %p521_p6, %p515_p3 }
   0xe   :  { %525 = shalt.err (!%p522_p7)
}
   0xf   :  { %s529_s11 = smov 64   ;;  %s530_s12 = smov 4  }
  0x10   :  { %26 = dma.hbm_to_vmem [thread:$0]  %s676_s1, 256, %s21_s25, [#allocation3], %s529_s11, %s529_s11, %s530_s12  }
  0x11   :  { %526 = dma.done.wait [#allocation3], 256  }
  0x12   :  { %527 = vsyncadd [#allocation3], 4294967040  ;;  %v531_v0 = vmov 0.0   ;;  %vm532_vm0 = vmmov 0   ;;  %v482_v1 = vld [vmem:[#allocation2] sm:$0xff]   ;;  %v483_v2 = vld [vmem:[#allocation2 + $0x8] sm:$0xff]   ;;  %v110_v17 = vlaneseq }
  0x13   :  { %429 = vmatprep.subr.bf16.mxu0 %v531_v0  ;;  %433 = vmatprep.mubr.msk.bf16.mxu0 %vm532_vm0, %v531_v0  ;;  %v41_v3 = vld [vmem:[%s675_s0] sm:$0xff]  ;;  %v42_v4 = vld [vmem:[%s675_s0 + $0x8] sm:$0xff]  ;;  %vm60_vm1 = vcmask 261120   ;;  %v486_v8 = vld [vmem:[%s678_s3 + $0x10] sm:$0xff]   ;;  %vm344_vm2 = vcmask 15360  }
  0x14   :  { %437 = vmatprep.subr.bf16.mxu1 %v531_v0  ;;  %453 = vmatprep.mubr.msk.bf16.mxu1 %vm532_vm0, %v531_v0  ;;  %v484_v5 = vld [vmem:[%s678_s3] sm:$0xff]   ;;  %v43_v6 = vpack.c.bf16 %v42_v4, %v41_v3  ;;  %v485_v7 = vld [vmem:[%s678_s3 + $0x8] sm:$0xff]   ;;  %v487_v9 = vld [vmem:[%s678_s3 + $0x18] sm:$0xff]   ;;  %v111_v18 = vshrl.u32 %v110_v17, 7 }
  0x15   :  { %430 = vmatpush3.bf16.msra.mxu0 %v482_v1  ;;  %438 = vmatpush3.bf16.msra.mxu1 %v484_v5  ;;  %v488_v10 = vld [vmem:[%s678_s3 + $0x20] sm:$0xff]   ;;  %v489_v11 = vld [vmem:[%s678_s3 + $0x28] sm:$0xff]   ;;  %v490_v12 = vld [vmem:[%s678_s3 + $0x30] sm:$0xff]  }
  0x16   :  { %431 = vmatprep.subr.bf16.mxu0 %v531_v0  ;;  %439 = vmatprep.subr.bf16.mxu1 %v531_v0  ;;  %v491_v13 = vld [vmem:[%s678_s3 + $0x38] sm:$0xff]   ;;  %v492_v14 = vld [vmem:[%s680_s5] sm:$0xff]   ;;  %v493_v15 = vld [vmem:[%s680_s5 + $0x8] sm:$0xff]   ;;  %v112_v21 = vsub.s32 0, %v111_v18 }
  0x17   :  { %v494_v16 = vld [vmem:[%s680_s5 + $0x10] sm:$0xff]   ;;  %v106_v19 = vld [vmem:[%s677_s2] sm:$0x1]  ;;  %v495_v30 = vld [vmem:[%s680_s5 + $0x18] sm:$0xff]  }
  0x18   :  { %v108_v20 = vpack.i.b16 %v106_v19, %v106_v19  ;;  %v496_v31 = vld [vmem:[%s680_s5 + $0x20] sm:$0xff]   ;;  %v497_v32 = vld [vmem:[%s680_s5 + $0x28] sm:$0xff]   ;;  %v498_v33 = vld [vmem:[%s680_s5 + $0x30] sm:$0xff]  }
  0x19   :  { %432 = vmatpush3.bf16.msra.mxu0 %v483_v2  ;;  %440 = vmatpush3.bf16.msra.mxu1 %v485_v7  ;;  %v499_v34 = vld [vmem:[%s680_s5 + $0x38] sm:$0xff]   ;;  %v222_v35 = vld [vmem:[%s679_s4] sm:$0x1] }
  0x1a   :  { %457 = vmatprep.subr.bf16.mxu0 %v531_v0  ;;  %441 = vmatprep.subr.bf16.mxu1 %v531_v0  ;;  %v113_v24 = vrot.slane %v108_v20, %v112_v21  ;;  %v224_v36 = vpack.i.b16 %v222_v35, %v222_v35  ;;  %v399_v45 = vld [vmem:[%s681_s6] ss:$0 sm:$0xff] }
  0x1c   :  { %434 = vmatmul.mubr.msk.bf16.vlgmr.msra.gmra.mrb[0].mxu0 %vm60_vm1, %v43_v6  ;;  %v229_v39 = vrot.slane %v224_v36, %v112_v21 }
  0x1d   :  { %473 = vmatprep.mubr.msk.bf16.mxu0 %vm532_vm0, %v531_v0  ;;  %442 = vmatpush3.bf16.msra.mxu1 %v486_v8 }
  0x1e   :  { %443 = vmatprep.subr.bf16.mxu1 %v531_v0  ;;  %458 = vmatpush3.bf16.msra.mxu0 %v492_v14 }
  0x1f   :  { %459 = vmatprep.subr.bf16.mxu0 %v531_v0 }
  0x21   :  { %444 = vmatpush3.bf16.msra.mxu1 %v487_v9 }
  0x22   :  { %445 = vmatprep.subr.bf16.mxu1 %v531_v0  ;;  %460 = vmatpush3.bf16.msra.mxu0 %v493_v15 }
  0x23   :  { %461 = vmatprep.subr.bf16.mxu0 %v531_v0 }
  0x25   :  { %446 = vmatpush3.bf16.msra.mxu1 %v488_v10 }
  0x26   :  { %447 = vmatprep.subr.bf16.mxu1 %v531_v0  ;;  %462 = vmatpush3.bf16.msra.mxu0 %v494_v16 }
  0x27   :  { %463 = vmatprep.subr.bf16.mxu0 %v531_v0 }
  0x29   :  { %448 = vmatpush3.bf16.msra.mxu1 %v489_v11 }
  0x2a   :  { %449 = vmatprep.subr.bf16.mxu1 %v531_v0  ;;  %464 = vmatpush3.bf16.msra.mxu0 %v495_v30 }
  0x2b   :  { %465 = vmatprep.subr.bf16.mxu0 %v531_v0 }
  0x2d   :  { %450 = vmatpush3.bf16.msra.mxu1 %v490_v12 }
  0x2e   :  { %451 = vmatprep.subr.bf16.mxu1 %v531_v0  ;;  %466 = vmatpush3.bf16.msra.mxu0 %v496_v31 }
  0x2f   :  { %467 = vmatprep.subr.bf16.mxu0 %v531_v0 }
  0x31   :  { %452 = vmatpush3.bf16.msra.mxu1 %v491_v13 }
  0x32   :  { %468 = vmatpush3.bf16.msra.mxu0 %v497_v32 }
  0x33   :  { %469 = vmatprep.subr.bf16.mxu0 %v531_v0 }
  0x36   :  { %470 = vmatpush3.bf16.msra.mxu0 %v498_v33 }
  0x37   :  { %471 = vmatprep.subr.bf16.mxu0 %v531_v0 }
  0x3a   :  { %472 = vmatpush3.bf16.msra.mxu0 %v499_v34 }
  0xef   :  { %v98_v22 = vpop.f32.mrb[0].mxu0 }
  0xf0   :  { %v435_v23 = vpop.f32.mrb[1].mxu0 }
  0xf1   :  { %v101_v25 = vpop.f32.mrb[2].mxu0 }
  0xf2   :  { %v105_v26 = vpack.c.bf16 %v101_v25, %v98_v22  ;;  %v436_v27 = vpop.f32.mrb[3].mxu0 }
  0xf4   :  { %v114_v28 = vadd.bf16 %v113_v24, %v105_v26 }
  0xf6   :  { %500 = vtanh.bf16 %v114_v28 }
 0x101   :  { %v501_v29 = vpop.eup %500 }
 0x102   :  { %454 = vmatmul.mubr.bf16.vlgmr.msra.gmra.mrb[0].mxu1 %v501_v29 }
 0x1d5   :  { %v214_v37 = vpop.f32.mrb[0].mxu1 }
 0x1d6   :  { %v455_v38 = vpop.f32.mrb[1].mxu1 }
 0x1d7   :  { %v217_v40 = vpop.f32.mrb[2].mxu1 }
 0x1d8   :  { %v221_v41 = vpack.c.bf16 %v217_v40, %v214_v37  ;;  %v456_v42 = vpop.f32.mrb[3].mxu1 }
 0x1da   :  { %v230_v43 = vadd.bf16 %v229_v39, %v221_v41 }
 0x1dc   :  { %502 = vtanh.bf16 %v230_v43 }
 0x1e7   :  { %v503_v44 = vpop.eup %502 }
 0x1e8   :  { %474 = vmatmul.mubr.bf16.vlgmr.msra.gmra.mrb[4].mxu0 %v503_v44 }
 0x2bb   :  { %v337_v46 = vpop.f32.mrb[4].mxu0 }
 0x2bc   :  { %v338_v47 = vadd.f32 %v399_v45, %v337_v46  ;;  %v475_v48 = vpop.f32.mrb[5].mxu0 }
 0x2bd   :  { %v340_v49 = vpop.f32.mrb[6].mxu0 }
 0x2be   :  { %345 = vst.msk [vmem:[#allocation4] sm:$0xff] %vm344_vm2, %v338_v47  ;;  %v476_v50 = vpop.f32.mrb[7].mxu0 }
 0x2c5   :  { %v376_v51 = vld [vmem:[#allocation4] sm:$0xff] }
 0x2c6   :  { %377 = vst [vmem:[%s682_s7] sm:$0xff] %v376_v51 }
 0x2c7   :  { %383 = vsyncpa [#allocation3], 1 }

</bundles_post_ra>
